<compile_context>
chip_gen: v7x
topology: tpu7x:2x2x1
jax: 0.10.0
libtpu: 0.0.40
codegen_flags: <defaults>
</compile_context>

<pallas_src>
import jax
import jax.numpy as jnp
from jax.experimental import pallas as pl
from jax.experimental.pallas import tpu as pltpu


def _round_up(x, m):
    return (x + m - 1) // m * m


def highway_stack_kernel(w_ref, b_ref, x_ref, out_ref):
    """One grid step == one highway layer applied to the resident activation."""
    layer = pl.program_id(1)

    # Initialize the resident accumulator (out_ref) with the input on layer 0.
    @pl.when(layer == 0)
    def _():
        out_ref[...] = x_ref[...]

    x = out_ref[...]                       # [tm, Dp] float32
    d = x.shape[-1]

    # Fused projection: [tm, Dp] @ [Dp, 2*Dp] -> [tm, 2*Dp], f32 accumulation.
    proj = jnp.dot(x.astype(jnp.bfloat16), w_ref[0],
                   preferred_element_type=jnp.float32) + b_ref[0]

    non_lin = jnp.maximum(proj[:, :d], 0.0)        # ReLU path
    gate = jax.nn.sigmoid(proj[:, d:])             # gate path

    # y = g*x + (1-g)*n  ==  x + (1-g)*(n-x)
    out_ref[...] = x + (1.0 - gate) * (non_lin - x)


def highways_forward(x, weight, bias):
    """Apply a stack of highway layers.

    x      : [batch, D]          float32
    weight : [n_layers, 2D, D]   float32, PyTorch nn.Linear layout
                                 (rows 0:D -> non-linearity, rows D:2D -> gate)
    bias   : [n_layers, 2D]      float32 (bias[:, D:] initialized to 1)
    """
    n_layers = weight.shape[0]
    batch, D = x.shape

    Dp = _round_up(D, 128)                       # lane-dense feature dim
    tm = min(256, _round_up(batch, 8))           # batch tile (MXU-friendly cap)
    Bp = _round_up(batch, tm)

    # Pre-transpose to x@W layout, split halves, zero-pad each half to Dp,
    # re-fuse as [non_lin | gate] -> [L, Dp, 2*Dp], stored bf16.
    w_t = jnp.transpose(weight, (0, 2, 1))                              # [L, D, 2D]
    w_nl = jnp.pad(w_t[:, :, :D], ((0, 0), (0, Dp - D), (0, Dp - D)))
    w_g = jnp.pad(w_t[:, :, D:], ((0, 0), (0, Dp - D), (0, Dp - D)))
    w_fused = jnp.concatenate([w_nl, w_g], axis=-1).astype(jnp.bfloat16)  # [L, Dp, 2Dp]

    b_nl = jnp.pad(bias[:, :D], ((0, 0), (0, Dp - D)))
    b_g = jnp.pad(bias[:, D:], ((0, 0), (0, Dp - D)))
    b_fused = jnp.concatenate([b_nl, b_g], axis=-1)[:, None, :].astype(jnp.float32)

    x_p = jnp.pad(x.astype(jnp.float32), ((0, Bp - batch), (0, Dp - D)))

    out = pl.pallas_call(
        highway_stack_kernel,
        out_shape=jax.ShapeDtypeStruct((Bp, Dp), jnp.float32),
        grid_spec=pltpu.PrefetchScalarGridSpec(
            num_scalar_prefetch=0,
            grid=(Bp // tm, n_layers),
            in_specs=[
                pl.BlockSpec((1, Dp, 2 * Dp), lambda b, l: (l, 0, 0)),  # fused W (bf16)
                pl.BlockSpec((1, 1, 2 * Dp), lambda b, l: (l, 0, 0)),   # fused bias (f32)
                pl.BlockSpec((tm, Dp), lambda b, l: (b, 0)),            # input block
            ],
            # Same block index for all layers -> VMEM-resident accumulator.
            out_specs=pl.BlockSpec((tm, Dp), lambda b, l: (b, 0)),
        ),
        compiler_params=pltpu.CompilerParams(
            dimension_semantics=("parallel", "arbitrary"),
        ),
    )(w_fused, b_fused, x_p)

    return out[:batch, :D]


def highways_reference(x, weight, bias):
    """Pure-JAX reference matching the PyTorch forward (bf16 weights, f32 acc)."""
    D = x.shape[-1]
    y = x
    for l in range(weight.shape[0]):
        w_l = jnp.transpose(weight[l]).astype(jnp.bfloat16)     # [D, 2D]
        proj = jnp.dot(y.astype(jnp.bfloat16), w_l,
                       preferred_element_type=jnp.float32) + bias[l]
        non_lin = jnp.maximum(proj[:, :D], 0.0)
        gate = jax.nn.sigmoid(proj[:, D:])
        y = gate * y + (1.0 - gate) * non_lin
    return y


if __name__ == "__main__":
    def run_case(batch, input_dim, n_layers):
        key = jax.random.PRNGKey(0)
        kx, kw, kb = jax.random.split(key, 3)
        scale = 1.0 / jnp.sqrt(jnp.float32(input_dim))
        x = jax.random.normal(kx, (batch, input_dim), dtype=jnp.float32)
        # PyTorch nn.Linear(input_dim, 2*input_dim) layout: weight [2D, D], bias [2D].
        w = jax.random.normal(kw, (n_layers, 2 * input_dim, input_dim),
                              dtype=jnp.float32) * scale
        b = jax.random.normal(kb, (n_layers, 2 * input_dim), dtype=jnp.float32) * scale
        # self.layer.bias[input_dim:].data.fill_(1)  -> gate bias = 1.
        b = b.at[:, input_dim:].set(1.0)

        out = jax.block_until_ready(highways_forward(x, w, b))
        ref = highways_reference(x, w, b)
        assert out.shape == (batch, input_dim)
        assert jnp.allclose(out, ref, atol=1e-3, rtol=1e-3), float(
            jnp.max(jnp.abs(out - ref)))

    # Lane-dense case (D multiple of 128, batch multiple of 8).
    run_case(batch=8, input_dim=128, n_layers=3)
    # Ragged case: exercises batch / feature padding path.
    run_case(batch=5, input_dim=96, n_layers=2)

    print("KERNEL_OK")
</pallas_src>

<mosaic_0001>
module attributes {stable_mosaic.version = 11 : i64} {
  func.func @highway_stack_kernel(%arg0: i32, %arg1: i32, %arg2: memref<1x128x256xbf16, #tpu.memory_space<vmem>>, %arg3: memref<1x1x256xf32, #tpu.memory_space<vmem>>, %arg4: memref<8x128xf32, #tpu.memory_space<vmem>>, %arg5: memref<8x128xf32, #tpu.memory_space<vmem>>) attributes {dimension_semantics = [#tpu.dimension_semantics<parallel>, #tpu.dimension_semantics<arbitrary>], iteration_bounds = array<i64: 1, 3>, scalar_prefetch = 0 : i64, scratch_operands = 0 : i64, tpu.core_type = #tpu.core_type<tc>, window_params = [{transform_indices = @transform_0, window_bounds = array<i64: 1, 128, 256>}, {transform_indices = @transform_1, window_bounds = array<i64: 1, 1, 256>}, {transform_indices = @transform_2, window_bounds = array<i64: 8, 128>}, {transform_indices = @transform_3, window_bounds = array<i64: 8, 128>}]} {
    %c0_i32 = arith.constant 0 : i32
    %0 = arith.cmpi eq, %arg1, %c0_i32 : i32
    %1 = arith.extui %0 : i1 to i32
    %c0_i32_0 = arith.constant 0 : i32
    %2 = arith.cmpi ne, %1, %c0_i32_0 : i32
    scf.if %2 {
      %c0_13 = arith.constant 0 : index
      %c0_14 = arith.constant 0 : index
      %27 = vector.load %arg4[%c0_13, %c0_14] : memref<8x128xf32, #tpu.memory_space<vmem>>, vector<8x128xf32>
      %c0_15 = arith.constant 0 : index
      %c0_16 = arith.constant 0 : index
      %28 = vector.load %arg5[%c0_15, %c0_16] : memref<8x128xf32, #tpu.memory_space<vmem>>, vector<8x128xf32>
      tpu.vector_store %arg5[%c0_15, %c0_16], %27 {strides = array<i32>} : memref<8x128xf32, #tpu.memory_space<vmem>>, vector<8x128xf32>,
    } else {
    }
    %c0 = arith.constant 0 : index
    %c0_1 = arith.constant 0 : index
    %3 = vector.load %arg5[%c0, %c0_1] : memref<8x128xf32, #tpu.memory_space<vmem>>, vector<8x128xf32>
    %4 = arith.truncf %3 : vector<8x128xf32> to vector<8x128xbf16>
    %c0_2 = arith.constant 0 : index
    %c0_3 = arith.constant 0 : index
    %c0_4 = arith.constant 0 : index
    %5 = vector.load %arg2[%c0_2, %c0_3, %c0_4] : memref<1x128x256xbf16, #tpu.memory_space<vmem>>, vector<1x128x256xbf16>
    %6 = vector.shape_cast %5 : vector<1x128x256xbf16> to vector<128x256xbf16>
    %cst = arith.constant dense<0.000000e+00> : vector<8x256xf32>
    %7 = tpu.matmul %4, %6, %cst {dimension_numbers = #tpu.dot_dimension_numbers<[1], [0], [0], [1], [0, 0, 1, 1], [], []>} : vector<8x128xbf16>, vector<128x256xbf16>, vector<8x256xf32> -> vector<8x256xf32>
    %c0_5 = arith.constant 0 : index
    %c0_6 = arith.constant 0 : index
    %c0_7 = arith.constant 0 : index
    %8 = vector.load %arg3[%c0_5, %c0_6, %c0_7] : memref<1x1x256xf32, #tpu.memory_space<vmem>>, vector<1x1x256xf32>
    %9 = vector.shape_cast %8 : vector<1x1x256xf32> to vector<1x256xf32>
    %10 = vector.broadcast %9 : vector<1x256xf32> to vector<8x256xf32>
    %11 = arith.addf %7, %10 : vector<8x256xf32>
    %12 = vector.extract_strided_slice %11 {offsets = [0, 0], sizes = [8, 128], strides = [1, 1]} : vector<8x256xf32> to vector<8x128xf32>
    %cst_8 = arith.constant 0.000000e+00 : f32
    %13 = vector.broadcast %cst_8 : f32 to vector<8x128xf32>
    %14 = arith.maximumf %12, %13 : vector<8x128xf32>
    %15 = vector.extract_strided_slice %11 {offsets = [0, 128], sizes = [8, 128], strides = [1, 1]} : vector<8x256xf32> to vector<8x128xf32>
    %16 = arith.negf %15 : vector<8x128xf32>
    %17 = math.exp %16 : vector<8x128xf32>
    %cst_9 = arith.constant 1.000000e+00 : f32
    %18 = vector.broadcast %cst_9 : f32 to vector<8x128xf32>
    %19 = arith.addf %18, %17 : vector<8x128xf32>
    %20 = arith.divf %18, %19 : vector<8x128xf32>
    %cst_10 = arith.constant 1.000000e+00 : f32
    %21 = vector.broadcast %cst_10 : f32 to vector<8x128xf32>
    %22 = arith.subf %21, %20 : vector<8x128xf32>
    %23 = arith.subf %14, %3 : vector<8x128xf32>
    %24 = arith.mulf %22, %23 : vector<8x128xf32>
    %25 = arith.addf %3, %24 : vector<8x128xf32>
    %c0_11 = arith.constant 0 : index
    %c0_12 = arith.constant 0 : index
    %26 = vector.load %arg5[%c0_11, %c0_12] : memref<8x128xf32, #tpu.memory_space<vmem>>, vector<8x128xf32>
    tpu.vector_store %arg5[%c0_11, %c0_12], %25 {strides = array<i32>} : memref<8x128xf32, #tpu.memory_space<vmem>>, vector<8x128xf32>,
    return
  }
  func.func @transform_0(%arg0: i32, %arg1: i32) -> (i32, i32, i32) {
    %c0_i32 = arith.constant 0 : i32
    %c0_i32_0 = arith.constant 0 : i32
    %c0_i32_1 = arith.constant 0 : i32
    return %arg1, %c0_i32, %c0_i32_0 : i32, i32, i32
  }
  func.func @transform_1(%arg0: i32, %arg1: i32) -> (i32, i32, i32) {
    %c0_i32 = arith.constant 0 : i32
    %c0_i32_0 = arith.constant 0 : i32
    %c0_i32_1 = arith.constant 0 : i32
    return %arg1, %c0_i32, %c0_i32_0 : i32, i32, i32
  }
  func.func @transform_2(%arg0: i32, %arg1: i32) -> (i32, i32) {
    %c0_i32 = arith.constant 0 : i32
    %c0_i32_0 = arith.constant 0 : i32
    return %arg0, %c0_i32 : i32, i32
  }
  func.func @transform_3(%arg0: i32, %arg1: i32) -> (i32, i32) {
    %c0_i32 = arith.constant 0 : i32
    %c0_i32_0 = arith.constant 0 : i32
    return %arg0, %c0_i32 : i32, i32
  }
}

</mosaic_0001>

<bundles_post_ra>
// kernel: tpu_custom_call.1
= control target key start
LH: loop header
LB: loop body
LE: loop exit
PB: predicated region body
PF: predicated region fallthrough
CT: control target
= control target key end

     0   :  { %8 = vsyncpa [#allocation3], 0  ;;  %s1117_s0 = inlined_call_operand.hbm [shape: bf16[3,128,256], index: 0, kind: input, shape index: {}]   ;;  %s1118_s1 = inlined_call_operand.hbm [shape: f32[3,1,256], index: 1, kind: input, shape index: {}]   ;;  %s1119_s2 = inlined_call_operand.hbm [shape: f32[8,128], index: 2, kind: input, shape index: {}]   ;;  %s1120_s3 = inlined_call_operand.hbm [shape: f32[8,128], index: 3, kind: output, shape index: {}]  }
   0x1   :  { %10 = vsyncpa [#allocation3 + $0x1], 0 }
   0x2   :  { %11 = vsyncpa [#allocation6], 0 }
   0x3   :  { %13 = vsyncpa [#allocation6 + $0x1], 0 }
   0x4   :  { %14 = vsyncpa [#allocation4], 0  ;;  %s877_s12 = smov 0   ;;  %s879_s13 = smov 0  }
   0x5   :  { %s881_s14 = smov 0   ;;  %s883_s15 = smov 0  }
   0x6   :  { %s885_s16 = smov 0   ;;  %s887_s17 = smov 0  }
   0x7 LB: > { %s906_s18 = sadd.s32 4294967295, %s848_s17   ;;  %s39_s19 = sadd.s32 1, %s836_s14  ;;  %s848_s17 = sphi %s887_s17, %s20_s17   ;;  %s844_s16 = sphi %s885_s16, %s1139_s16   ;;  %s840_s15 = sphi %s883_s15, %s1138_s15   ;;  %s836_s14 = sphi %s881_s14, %s1137_s14   ;;  %s832_s13 = sphi %s879_s13, %s1136_s13   ;;  %s828_s12 = sphi %s877_s12, %s1135_s12  }
   0x8   : > { %p46_p0 = scmp.ne.s32.totalorder %s836_s14, %s832_s13  ;;  %p47_p1 = scmp.eq.s32.totalorder %s848_s17, 0 }
   0x9   : > { %p52_p2 = scmp.ne.s32.totalorder %s832_s13, %s828_s12  ;;  %p1121_p3 = scmp.eq.s32.totalorder %s906_s18, 0 }
   0xa   : > { %p48_p4 = por %p47_p1, %p46_p0  ;;  %p526_p5 = scmp.ge.s32.totalorder %s848_s17, 1 }
   0xb   : > { %p917_p6 = por %p1121_p3, %p52_p2  ;;  %p141_p7 = scmp.lt.s32.totalorder %s848_s17, 4 }
   0xc   : > { %s850_s22 = smov [#allocation7]   ;;  %p587_p10 = scmp.lt.s32.totalorder %s848_s17, 3 }
   0xd   : > { %s1125_s20 = scalar_select %p917_p6, 1, 0 }
   0xe   : > { %p922_p8 = pnand %p526_p5, %p141_p7  ;;  %s156_s23 = sshll.u32 %s850_s22, 4  ;;  %s157_s23 = int_to_ptr.vmem [resolvable:$true] %s156_s23 }
   0xf   : > { %s930_s24 = sand.u32 1, %s836_s14   ;;  %p938_p12 = pnand %p587_p10, %p48_p4 }
  0x10   : > { %s1126_s21 = scalar_select %p922_p8, 1, 0 }
  0x11   : > { %p575_p9 = pneg %p922_p8  ;;  %s672_s29 = scalar_lea.hbm %s1119_s2, 128 }
  0x12   : > { %s1128_s26 = scalar_select %p938_p12, 1, 0 }
  0x13   : > { %p934_p11 = pnand %p575_p9, %p1121_p3  ;;  %p673_p13 = scmp.ne.s32.totalorder %s1119_s2, %s672_s29 }
  0x14   : > { %p679_p5 = scmp.lt.u32.totalorder %s672_s29, %s1119_s2 }
  0x15   : > { %p674_p0 = pneg %p934_p11 }
  0x17   : > { %p675_p1 = pnand %p674_p0, %p673_p13 }
  0x19   : > { %p676_p2 = pneg %p675_p1 }
  0x1b   : > { %p681_p4 = pnand %p679_p5, %p676_p2 }
  0x1d   : > { %684 = shalt.err (!%p681_p4)
}
  0x1e   : > { %s685_s7 = scalar_lea.vmem %s157_s23, 128  ;;  %p693_p3 = scmp.lt.s32.totalorder %s157_s23, %s157_s23 }
  0x1f   : > { %p686_p7 = scmp.ne.s32.totalorder %s157_s23, %s685_s7  ;;  %p694_p6 = scmp.lt.s32.totalorder %s685_s7, %s685_s7 }
  0x21   : > { %p688_p9 = pnand %p686_p7, %p674_p0  ;;  %p695_p8 = por %p694_p6, %p693_p3 }
  0x23   : > { %p689_p10 = pneg %p688_p9 }
  0x25   : > { %p696_p12 = pnand %p695_p8, %p689_p10 }
  0x27   : > { %699 = shalt.err (!%p696_p12)
}
  0x28   : > { %578 = dma.hbm_to_vmem [thread:$0]  (!%p934_p11), %s1119_s2, 128, %s157_s23, [#allocation6]  }
  0x29   : > { %s29_s10 = sadd.s32 1, %s844_s16  ;;  %s529_s11 = sshll.u32 %s930_s24, 7 }
  0x2a   : > { %p30_p13 = scmp.ge.s32.totalorder %s29_s10, 3  ;;  %s561_s12 = sshll.u32 %s844_s16, 11 }
  0x2b   : > { %s171_s22 = scalar_lea.vmem [#allocation2], %s529_s11  ;;  %s966_s29 = scalar_lea.hbm %s1117_s0, %s561_s12 }
  0x2c   : > { %s178_s27 = sshll.u32 %s171_s22, 4  ;;  %s1141_s10 = smov (%p30_p13, %s29_s10), 0  ;;  %s968_s27 = int_to_ptr.vmem [resolvable:$true] %s178_s27 }
  0x2d   : > { %s36_s23 = ssub.s32 %s844_s16, %s1141_s10  ;;  %s168_s4 = scalar_lea.sflag [#allocation3], %s930_s24 }
  0x2e   : > { %p972_p3 = scmp.eq.s32.totalorder %s36_s23, 0  ;;  %s700_s5 = scalar_lea.hbm %s966_s29, 2048 }
  0x2f   : > { %p701_p6 = scmp.ne.s32.totalorder %s966_s29, %s700_s5  ;;  %p1130_p8 = scmp.ne.s32.totalorder %s1128_s26, 0 }
  0x30   : > { %s705_s8 = scalar_lea.hbm %s1117_s0, 6144  ;;  %p706_p1 = scmp.lt.u32.totalorder %s966_s29, %s1117_s0 }
  0x31   : > { %p702_p11 = pneg %p1130_p8  ;;  %p707_p2 = scmp.lt.u32.totalorder %s705_s8, %s700_s5 }
  0x32   : > { %p709_p4 = scmp.lt.u32.totalorder %s700_s5, %s966_s29 }
  0x33   : > { %p703_p12 = pnand %p702_p11, %p701_p6  ;;  %p708_p5 = por %p707_p2, %p706_p1 }
  0x35   : > { %p704_p0 = pneg %p703_p12  ;;  %p710_p7 = por %p709_p4, %p708_p5 }
  0x37   : > { %p711_p9 = pnand %p710_p7, %p704_p0 }
  0x39   : > { %714 = shalt.err (!%p711_p9)
}
  0x3a   : > { %s715_s12 = scalar_lea.vmem %s968_s27, 2048  ;;  %s851_s22 = smov [#allocation2]  }
  0x3b   : > { %p716_p10 = scmp.ne.s32.totalorder %s968_s27, %s715_s12  ;;  %s720_s25 = sshll.u32 %s851_s22, 4  ;;  %s721_s25 = int_to_ptr.vmem [resolvable:$false] %s720_s25 }
  0x3c   : > { %s722_s28 = scalar_lea.vmem %s721_s25, 4096  ;;  %p723_p12 = scmp.lt.s32.totalorder %s968_s27, %s721_s25 }
  0x3d   : > { %p718_p13 = pnand %p716_p10, %p702_p11  ;;  %p724_p1 = scmp.lt.s32.totalorder %s722_s28, %s715_s12 }
  0x3f   : > { %p719_p6 = pneg %p718_p13  ;;  %p725_p2 = por %p724_p1, %p723_p12 }
  0x41   : > { %p726_p5 = pnand %p725_p2, %p719_p6 }
  0x43   : > { %729 = shalt.err (!%p726_p5)
}
  0x44   : > { %s852_s23 = smov 128   ;;  %s853_s5 = smov 8  }
  0x45   : > { %582 = dma.hbm_to_vmem [thread:$0]  (!%p1130_p8), %s966_s29, 2048, %s968_s27, %s168_s4, %s852_s23, %s852_s23, %s853_s5  }
  0x46   : > { %s1009_s6 = scalar_select %p972_p3, %s836_s14, %s39_s19  }
  0x47   : > { %s188_s7 = sand.u32 1, %s848_s17   ;;  %s532_s8 = sshll.u32 %s930_s24, 1 }
  0x48   : > { %s562_s9 = sshll.u32 %s844_s16, 5  ;;  %s192_s11 = scalar_lea.vmem [#allocation5], %s532_s8 }
  0x49   : > { %s200_s12 = sshll.u32 %s192_s11, 4  ;;  %s1017_s28 = scalar_lea.hbm %s1118_s1, %s562_s9  ;;  %s201_s12 = int_to_ptr.vmem [resolvable:$true] %s200_s12 }
  0x4a   : > { %s189_s27 = scalar_lea.sflag [#allocation6], %s188_s7  ;;  %s730_s29 = scalar_lea.hbm %s1017_s28, 32 }
  0x4b   : > { %p731_p0 = scmp.ne.s32.totalorder %s1017_s28, %s730_s29  ;;  %s735_s30 = scalar_lea.hbm %s1118_s1, 96 }
  0x4c   : > { %p736_p7 = scmp.lt.u32.totalorder %s1017_s28, %s1118_s1  ;;  %p737_p9 = scmp.lt.u32.totalorder %s735_s30, %s730_s29 }
  0x4d   : > { %p733_p3 = pnand %p731_p0, %p702_p11  ;;  %p739_p13 = scmp.lt.u32.totalorder %s730_s29, %s1017_s28 }
  0x4e   : > { %p738_p10 = por %p737_p9, %p736_p7 }
  0x4f   : > { %p734_p4 = pneg %p733_p3 }
  0x50   : > { %p740_p6 = por %p739_p13, %p738_p10 }
  0x52   : > { %p741_p12 = pnand %p740_p6, %p734_p4 }
  0x54   : > { %744 = shalt.err (!%p741_p12)
}
  0x55   : > { %s745_s5 = scalar_lea.vmem %s201_s12, 32  ;;  %s854_s7 = smov [#allocation5]  }
  0x56   : > { %p746_p1 = scmp.ne.s32.totalorder %s201_s12, %s745_s5  ;;  %s750_s8 = sshll.u32 %s854_s7, 4  ;;  %s751_s8 = int_to_ptr.vmem [resolvable:$false] %s750_s8 }
  0x57   : > { %s752_s9 = scalar_lea.vmem %s751_s8, 64  ;;  %p753_p0 = scmp.lt.s32.totalorder %s201_s12, %s751_s8 }
  0x58   : > { %p748_p2 = pnand %p746_p1, %p702_p11  ;;  %p754_p3 = scmp.lt.s32.totalorder %s752_s9, %s745_s5 }
  0x5a   : > { %p749_p5 = pneg %p748_p2  ;;  %p755_p7 = por %p754_p3, %p753_p0 }
  0x5c   : > { %p756_p9 = pnand %p755_p7, %p749_p5 }
  0x5e   : > { %759 = shalt.err (!%p756_p9)
}
  0x5f   : > { %585 = dma.hbm_to_vmem [thread:$0]  (!%p1130_p8), %s1017_s28, 32, %s201_s12, %s189_s27  }
  0x60   : > { %p1131_p4 = scmp.ne.s32.totalorder %s1126_s21, 0 }
  0x61   : > { %s211_s11 = sand.u32 (!%p1131_p4), 1, %s832_s13   ;;  %p1132_p11 = scmp.ne.s32.totalorder (!%p1131_p4), %s1125_s20, 0 }
  0x62   : > { %209 = sbr.rel (%p1131_p4) target bundleno = 416 (0x1a0), region = 32  ;;  %s536_s22 = sshll.u32 (!%p1131_p4), %s211_s11, 7 }
  0x63   : > { %s212_s25 = scalar_lea.sflag (!%p1131_p4), [#allocation3], %s211_s11  ;;  %s1041_s29 = scalar_lea.vmem (!%p1131_p4), [#allocation2], %s536_s22 }
  0x69   : > { %811 = dma.done.wait (%p1132_p11), %s212_s25, 2048  }
  0x6a   : > { %813 = vsyncadd (%p1132_p11), %s212_s25, 4294965248  ;;  %s220_s26 = sand.u32 1, %s906_s18   ;;  %s537_s19 = sshll.u32 %s211_s11, 1 }
  0x6b   : > { %s221_s12 = scalar_lea.sflag [#allocation6], %s220_s26  ;;  %s1048_s28 = scalar_lea.vmem [#allocation5], %s537_s19 }
  0x6c   : > { %815 = dma.done.wait (%p1132_p11), %s221_s12, 32  }
  0x6d   : > { %817 = vsyncadd (%p1132_p11), %s221_s12, 4294967264  ;;  %p1133_p8 = scmp.eq.s32.totalorder %s906_s18, 0 }
  0x6f   : > { %819 = dma.done.wait (%p1133_p8), [#allocation6], 128   ;;  %p1134_p10 = pmov %p1133_p8 }
  0x70   : > { %p539_p13 = scmp.ne.s32.totalorder %s840_s15, 0 }
  0x71   : > { %821 = vsyncadd (%p1134_p10), [#allocation6], 4294967168  ;;  %v256_v0 = vld [vmem:[#allocation7] sm:$0xff] (!%p539_p13) }
  0x72   : > { %255 = sbr.rel (%p539_p13) target bundleno = 121 (0x79), region = 48  ;;  %257 = vst [vmem:[#allocation8] sm:$0xff] (!%p539_p13), %v256_v0 }
  0x79 PF: > { %v644_v1 = vld [vmem:[%s1041_s29 + $0x4] ss:$8 sps:$4 sm:$0xff]   ;;  %v646_v2 = vld [vmem:[%s1041_s29] ss:$8 sps:$4 sm:$0xff]   ;;  %v855_v3 = vmov 0   ;;  %v278_v20 = vlaneseq  ;;  %s856_s15 = smov [#allocation8]  }
  0x7a   : > { %400 = vmatprep.mubr.bf16.mxu0 %v855_v3  ;;  %368 = vmatprep.subr.bf16.mxu0 %v644_v1  ;;  %v647_v4 = vld [vmem:[%s1041_s29 + $0x14] ss:$8 sps:$4 sm:$0xff]   ;;  %v649_v5 = vld [vmem:[%s1041_s29 + $0x10] ss:$8 sps:$4 sm:$0xff]   ;;  %v650_v6 = vld [vmem:[%s1041_s29 + $0x24] ss:$8 sps:$4 sm:$0xff]  }
  0x7b   : > { %369 = vmatpush1.bf16.msra.mxu0 %v646_v2  ;;  %v652_v7 = vld [vmem:[%s1041_s29 + $0x20] ss:$8 sps:$4 sm:$0xff]   ;;  %v653_v8 = vld [vmem:[%s1041_s29 + $0x34] ss:$8 sps:$4 sm:$0xff]   ;;  %v655_v9 = vld [vmem:[%s1041_s29 + $0x30] ss:$8 sps:$4 sm:$0xff]  }
  0x7c   : > { %370 = vmatprep.subr.bf16.mxu0 %v647_v4  ;;  %v656_v10 = vld [vmem:[%s1041_s29 + $0x44] ss:$8 sps:$4 sm:$0xff]   ;;  %v658_v11 = vld [vmem:[%s1041_s29 + $0x40] ss:$8 sps:$4 sm:$0xff]   ;;  %v659_v12 = vld [vmem:[%s1041_s29 + $0x54] ss:$8 sps:$4 sm:$0xff]  }
  0x7d   : > { %v661_v13 = vld [vmem:[%s1041_s29 + $0x50] ss:$8 sps:$4 sm:$0xff]   ;;  %v662_v14 = vld [vmem:[%s1041_s29 + $0x64] ss:$8 sps:$4 sm:$0xff]   ;;  %v664_v15 = vld [vmem:[%s1041_s29 + $0x60] ss:$8 sps:$4 sm:$0xff]  }
  0x7e   : > { %v665_v16 = vld [vmem:[%s1041_s29 + $0x74] ss:$8 sps:$4 sm:$0xff]   ;;  %v667_v17 = vld [vmem:[%s1041_s29 + $0x70] ss:$8 sps:$4 sm:$0xff]   ;;  %v279_v21 = vshrl.u32 %v278_v20, 7  ;;  %s430_s20 = sshll.u32 %s856_s15, 4  ;;  %s431_s20 = int_to_ptr.vmem [resolvable:$true] %s430_s20 }
  0x7f   : > { %371 = vmatpush1.bf16.msra.mxu0 %v649_v5  ;;  %v258_v18 = vld [vmem:[#allocation8] sm:$0xff]  ;;  %v276_v23 = vld [vmem:[%s1048_s28] sm:$0x3]  ;;  %p589_p6 = scmp.eq.s32.totalorder %s906_s18, 2  ;;  %s760_s21 = scalar_lea.vmem %s431_s20, 128 }
  0x80   : > { %372 = vmatprep.subr.bf16.mxu0 %v650_v6  ;;  %v259_v19 = vpack.c.bf16 %v258_v18, %v258_v18  ;;  %v284_v22 = vsub.s32 1, %v279_v21  ;;  %v280_v31 = vsub.s32 0, %v279_v21  ;;  %p761_p12 = scmp.ne.s32.totalorder %s431_s20, %s760_s21  ;;  %p767_p5 = scmp.lt.s32.totalorder %s431_s20, %s431_s20 }
  0x81   : > { %p768_p0 = scmp.lt.s32.totalorder %s760_s21, %s760_s21 }
  0x82   : > { %v285_v24 = vrot.slane %v276_v23, %v284_v22  ;;  %v281_v34 = vrot.slane %v276_v23, %v280_v31  ;;  %p762_p1 = pnand %p761_p12, %p589_p6 }
  0x83   : > { %373 = vmatpush1.bf16.msra.mxu0 %v652_v7  ;;  %p769_p3 = por %p768_p0, %p767_p5 }
  0x84   : > { %374 = vmatprep.subr.bf16.mxu0 %v653_v8  ;;  %p763_p2 = pneg %p762_p1 }
  0x86   : > { %p770_p7 = pnand %p769_p3, %p763_p2 }
  0x87   : > { %375 = vmatpush1.bf16.msra.mxu0 %v655_v9 }
  0x88   : > { %376 = vmatprep.subr.bf16.mxu0 %v656_v10 }
  0x8b   : > { %377 = vmatpush1.bf16.msra.mxu0 %v658_v11 }
  0x8c   : > { %378 = vmatprep.subr.bf16.mxu0 %v659_v12 }
  0x8f   : > { %379 = vmatpush1.bf16.msra.mxu0 %v661_v13 }
  0x90   : > { %380 = vmatprep.subr.bf16.mxu0 %v662_v14 }
  0x93   : > { %381 = vmatpush1.bf16.msra.mxu0 %v664_v15 }
  0x94   : > { %382 = vmatprep.subr.bf16.mxu0 %v665_v16 }
  0x97   : > { %383 = vmatpush1.bf16.msra.mxu0 %v667_v17 }
  0x9a   : > { %401 = vmatmul.mubr.bf16.vlgmr.msra.gmra.mrb[0].mxu0 %v259_v19 }
 0x16d   : > { %v402_v25 = vpop.f32.mrb[0].mxu0 }
 0x16e   : > { %v404_v26 = vpop.f32.mrb[1].mxu0  ;;  %v403_v35 = vadd.f32 %v402_v25, %v281_v34 }
 0x16f   : > { %v405_v27 = vadd.f32 %v404_v26, %v285_v24  ;;  %v406_v28 = vpop.f32.mrb[2].mxu0 }
 0x170   : > { %v407_v29 = vpop.f32.mrb[3].mxu0  ;;  %v409_v36 = vmax.f32 %v403_v35, 0.0 }
 0x171   : > { %v556_v30 = vmul.f32 -1.442695, %v405_v27 }
 0x172   : > { %v417_v38 = vsub.f32 %v409_v36, %v258_v18 }
 0x173   : > { %668 = vpow2.f32 %v556_v30 }
 0x17d   : > { %v669_v32 = vpop.eup %668 }
 0x17e   : > { %v413_v33 = vadd.f32 1.0, %v669_v32 }
 0x180   : > { %670 = vrcp.f32 %v413_v33 }
 0x18a   : > { %v671_v37 = vpop.eup %670 }
 0x18b   : > { %v416_v39 = vsub.f32 1.0, %v671_v37 }
 0x18d   : > { %v418_v40 = vmul.f32 %v417_v38, %v416_v39 }
 0x18f   : > { %v419_v41 = vadd.f32 %v418_v40, %v258_v18 }
 0x191   : > { %420 = vst [vmem:[#allocation8] sm:$0xff] %v419_v41 }
 0x192   : > { %773 = shalt.err (!%p770_p7)
}
 0x193   : > { %s774_s30 = scalar_lea.hbm %s1120_s3, 128 }
 0x194   : > { %p775_p9 = scmp.ne.s32.totalorder %s1120_s3, %s774_s30  ;;  %p780_p8 = scmp.lt.u32.totalorder %s774_s30, %s1120_s3 }
 0x196   : > { %p776_p4 = pnand %p775_p9, %p589_p6 }
 0x198   : > { %p777_p11 = pneg %p776_p4 }
 0x19a   : > { %p782_p10 = pnand %p780_p8, %p777_p11 }
 0x19c   : > { %785 = shalt.err (!%p782_p10)
}
 0x19d   : > { %572 = dma.vmem_to_hbm [thread:$0]  (%p589_p6), %s431_s20, 128, %s1120_s3, [#allocation4]  }
 0x19e   : > { %823 = dma.done.wait (%p589_p6), [#allocation4], 128  }
 0x19f   : > { %825 = vsyncadd (%p589_p6), [#allocation4], 4294967168 }
 0x1a0 PF: > { %s20_s17 = sadd.s32 1, %s848_s17   ;;  %s1135_s12 = smov %s832_s13 }
 0x1a1   : > { %p17_p13 = scmp.ge.s32.totalorder %s20_s17, 5   ;;  %s1136_s13 = smov %s836_s14 }
 0x1a2   : > { %s1137_s14 = smov %s1009_s6  ;;  %s1138_s15 = smov %s844_s16 }
 0x1a3   : > { %s1139_s16 = smov %s1141_s10  ;;  %19 = sbr.rel (!%p17_p13) target bundleno = 7 (0x7), region = 92 }
 0x1aa   :  { %443 = vsyncpa [#allocation3], 1 }
 0x1ab   :  { %445 = vsyncpa [#allocation3 + $0x1], 1 }
 0x1ac   :  { %446 = vsyncpa [#allocation6], 1 }
 0x1ad   :  { %448 = vsyncpa [#allocation6 + $0x1], 1 }
 0x1ae   :  { %449 = vsyncpa [#allocation4], 1 }
 0x1af   :  { %451 = vsyncpa [#allocation4 + $0x1], 1 }

</bundles_post_ra>
